<compile_context>
chip_gen: v7x
topology: tpu7x:2x2x1
jax: 0.10.0
libtpu: 0.0.40
codegen_flags: <defaults>
</compile_context>

<pallas_src>
import math

import numpy as np
import jax
import jax.numpy as jnp
from jax.experimental import pallas as pl
from jax.experimental.pallas import tpu as pltpu


def _round_up(x, m):
    return ((x + m - 1) // m) * m


def _fused_heads_kernel(hs_ref, w_ref, b_ref, out_ref, acc_ref):
    """One (tm, tk) token/hidden tile against the VMEM-resident (tk, Npad) weights."""
    k = pl.program_id(1)

    @pl.when(k == 0)
    def _():
        acc_ref[...] = jnp.zeros_like(acc_ref)

    acc_ref[...] += jnp.dot(
        hs_ref[...], w_ref[...], preferred_element_type=jnp.float32
    )

    @pl.when(k == pl.num_programs(1) - 1)
    def _():
        # Fused epilogue: bias add + cast while the accumulator is resident.
        out_ref[...] = (acc_ref[...] + b_ref[...]).astype(out_ref.dtype)


def fused_multi_head_linear(
    hidden_states,          # (T, H)
    weight,                 # (H, N)  all head weights concatenated on output dim
    bias,                   # (N,)
    *,
    tm_target=512,          # large token tiles; safe within v7x's 64 MiB VMEM
    tk_max=2048,            # keep full H as one K block when it fits
    compute_dtype=jnp.bfloat16,
    out_dtype=jnp.float32,
):
    T, H = hidden_states.shape
    H_w, N = weight.shape
    assert H == H_w, "hidden dim mismatch between hidden_states and head weights"

    # --- lane-dense padding of the concatenated label dim (>=128, x128) ---
    n_pad = max(_round_up(N, 128), 128)

    # --- hidden (reduction) dim: full H as a single K block when possible ---
    h_pad = _round_up(H, 128)
    if h_pad <= tk_max:
        tk = h_pad
    else:
        tk = tk_max
        h_pad = _round_up(h_pad, tk)

    # --- token dim: big sublane-aligned tiles ---
    t_aligned = _round_up(T, 8)
    tm = min(_round_up(tm_target, 8), t_aligned)
    t_pad = _round_up(t_aligned, tm)

    cdt = compute_dtype
    hs = jnp.zeros((t_pad, h_pad), cdt).at[:T, :H].set(hidden_states.astype(cdt))
    w = jnp.zeros((h_pad, n_pad), cdt).at[:H, :N].set(weight.astype(cdt))
    b = jnp.zeros((1, n_pad), jnp.float32).at[0, :N].set(bias.astype(jnp.float32))

    grid_m = t_pad // tm
    grid_k = h_pad // tk

    # Deeper input buffering only pays off when the token loop is long enough.
    hs_kwargs = {}
    if grid_m >= 4:
        hs_kwargs["pipeline_mode"] = pl.Buffered(3)

    in_specs = [
        # hidden_states: streamed over tokens (i) and K (k)
        pl.BlockSpec((tm, tk), lambda i, k: (i, k), **hs_kwargs),
        # weights / bias: index_map ignores the token axis -> VMEM resident
        pl.BlockSpec((tk, n_pad), lambda i, k: (k, 0)),
        pl.BlockSpec((1, n_pad), lambda i, k: (0, 0)),
    ]
    out_spec = pl.BlockSpec((tm, n_pad), lambda i, k: (i, 0))

    # VMEM footprint estimate (double-buffered inputs + f32 accumulator).
    cdt_bytes = np.dtype(cdt).itemsize
    out_bytes = np.dtype(out_dtype).itemsize
    vmem_est = (
        2 * (tm * tk + tk * n_pad) * cdt_bytes
        + 2 * tm * n_pad * out_bytes
        + tm * n_pad * 4
        + 2 * n_pad * 4
    )
    params_kwargs = dict(dimension_semantics=("parallel", "arbitrary"))
    if vmem_est > (30 << 20):
        # Raise the scoped limit only when needed; keep headroom, cap well
        # below v6e physical and only modestly above v7x's 64 MiB default.
        params_kwargs["vmem_limit_bytes"] = int(min(vmem_est + (8 << 20), 100 << 20))

    out = pl.pallas_call(
        _fused_heads_kernel,
        out_shape=jax.ShapeDtypeStruct((t_pad, n_pad), out_dtype),
        grid_spec=pltpu.PrefetchScalarGridSpec(
            num_scalar_prefetch=0,
            grid=(grid_m, grid_k),
            in_specs=in_specs,
            out_specs=out_spec,
            scratch_shapes=[pltpu.VMEM((tm, n_pad), jnp.float32)],
        ),
        compiler_params=pltpu.CompilerParams(**params_kwargs),
    )(hs, w, b)

    return out[:T, :N]


class CustomTokenClassificationModelPallas:
    """Pallas equivalent of CustomTokenClassificationModel's classification heads.

    The pretrained BERT backbone (`self.bert_model`) is external; its output
    `outputs.logits` (called hidden_states in the reference forward) is the
    input here.  Each nn.Linear(head_in, num_classes) head is fused into a
    single concatenated matmul, and the wrapper slices each head's logits back
    out (padded lanes never leave the wrapper).
    """

    def __init__(self, feature_values, hidden_dim, key):
        self.feature_seq = list(feature_values.keys())
        self.num_labels = [len(feature_values[k]) for k in self.feature_seq]
        bound = 1.0 / math.sqrt(hidden_dim)
        ws, bs = [], []
        for i, n in enumerate(self.num_labels):
            kw, kb = jax.random.split(jax.random.fold_in(key, i))
            ws.append(jax.random.uniform(kw, (hidden_dim, n), jnp.float32, -bound, bound))
            bs.append(jax.random.uniform(kb, (n,), jnp.float32, -bound, bound))
        self.weight = jnp.concatenate(ws, axis=1)   # (H, sum_labels)
        self.bias = jnp.concatenate(bs, axis=0)     # (sum_labels,)
        self.offsets = np.cumsum([0] + self.num_labels)

    def __call__(self, hidden_states):
        # hidden_states: (B, S, H) -- output of the (external) BERT model.
        B, S, H = hidden_states.shape
        flat = hidden_states.reshape(B * S, H)
        fused_logits = fused_multi_head_linear(flat, self.weight, self.bias)
        logits_list = []
        for i, n in enumerate(self.num_labels):
            lo, hi = int(self.offsets[i]), int(self.offsets[i + 1])
            logits_list.append(fused_logits[:, lo:hi].reshape(B, S, n))
        return logits_list


if __name__ == "__main__":
    # TODO(synk): the pretrained BERT backbone (self.bert_model) and
    # features.json loading are external; feature_values and hidden_states are
    # synthesized in-script with deterministic randomness.
    key = jax.random.PRNGKey(0)
    k_hs, k_params = jax.random.split(key)

    feature_values = {
        "pos": [f"p{i}" for i in range(17)],
        "gender": ["m", "f", "n"],
        "number": ["sg", "pl"],
        "case": [f"c{i}" for i in range(8)],
    }
    B, S, H = 2, 8, 128

    model = CustomTokenClassificationModelPallas(feature_values, H, k_params)
    hidden_states = jax.random.normal(k_hs, (B, S, H), jnp.float32)

    logits_list = model(hidden_states)
    logits_list = jax.block_until_ready(logits_list)

    # Reference matching the kernel's bf16-inputs / f32-accumulate path.
    hs_ref = hidden_states.reshape(B * S, H).astype(jnp.bfloat16).astype(jnp.float32)
    w_ref = model.weight.astype(jnp.bfloat16).astype(jnp.float32)
    ref_all = hs_ref @ w_ref + model.bias
    off = model.offsets
    for i, logits in enumerate(logits_list):
        ref = ref_all[:, int(off[i]):int(off[i + 1])].reshape(logits.shape)
        np.testing.assert_allclose(np.asarray(logits), np.asarray(ref),
                                   rtol=2e-2, atol=2e-2)

    print("KERNEL_OK")
</pallas_src>

<mosaic_0001>
module attributes {stable_mosaic.version = 11 : i64} {
  func.func @_fused_heads_kernel(%arg0: i32, %arg1: i32, %arg2: memref<16x128xbf16, #tpu.memory_space<vmem>>, %arg3: memref<128x128xbf16, #tpu.memory_space<vmem>>, %arg4: memref<1x128xf32, #tpu.memory_space<vmem>>, %arg5: memref<16x128xf32, #tpu.memory_space<vmem>>, %arg6: memref<16x128xf32, #tpu.memory_space<vmem>>) attributes {dimension_semantics = [#tpu.dimension_semantics<parallel>, #tpu.dimension_semantics<arbitrary>], iteration_bounds = array<i64: 1, 1>, scalar_prefetch = 0 : i64, scratch_operands = 1 : i64, tpu.core_type = #tpu.core_type<tc>, window_params = [{transform_indices = @transform_0, window_bounds = array<i64: 16, 128>}, {transform_indices = @transform_1, window_bounds = array<i64: 128, 128>}, {pipeline_mode = #tpu.pipeline_mode<synchronous>, transform_indices = @transform_2, window_bounds = array<i64: 1, 128>}, {transform_indices = @transform_3, window_bounds = array<i64: 16, 128>}]} {
    %c0_i32 = arith.constant 0 : i32
    %0 = arith.cmpi eq, %arg1, %c0_i32 : i32
    %1 = arith.extui %0 : i1 to i32
    %c0_i32_0 = arith.constant 0 : i32
    %2 = arith.cmpi ne, %1, %c0_i32_0 : i32
    scf.if %2 {
      %cst_10 = arith.constant 0.000000e+00 : f32
      %12 = vector.broadcast %cst_10 : f32 to vector<16x128xf32>
      %c0_11 = arith.constant 0 : index
      %c0_12 = arith.constant 0 : index
      %13 = vector.load %arg6[%c0_11, %c0_12] : memref<16x128xf32, #tpu.memory_space<vmem>>, vector<16x128xf32>
      tpu.vector_store %arg6[%c0_11, %c0_12], %12 {strides = array<i32>} : memref<16x128xf32, #tpu.memory_space<vmem>>, vector<16x128xf32>,
    } else {
    }
    %c0 = arith.constant 0 : index
    %c0_1 = arith.constant 0 : index
    %3 = vector.load %arg6[%c0, %c0_1] : memref<16x128xf32, #tpu.memory_space<vmem>>, vector<16x128xf32>
    %c0_2 = arith.constant 0 : index
    %c0_3 = arith.constant 0 : index
    %4 = vector.load %arg2[%c0_2, %c0_3] : memref<16x128xbf16, #tpu.memory_space<vmem>>, vector<16x128xbf16>
    %c0_4 = arith.constant 0 : index
    %c0_5 = arith.constant 0 : index
    %5 = vector.load %arg3[%c0_4, %c0_5] : memref<128x128xbf16, #tpu.memory_space<vmem>>, vector<128x128xbf16>
    %cst = arith.constant dense<0.000000e+00> : vector<16x128xf32>
    %6 = tpu.matmul %4, %5, %cst {dimension_numbers = #tpu.dot_dimension_numbers<[1], [0], [0], [1], [0, 0, 1, 1], [], []>} : vector<16x128xbf16>, vector<128x128xbf16>, vector<16x128xf32> -> vector<16x128xf32>
    %7 = arith.addf %3, %6 : vector<16x128xf32>
    %c0_6 = arith.constant 0 : index
    %c0_7 = arith.constant 0 : index
    %8 = vector.load %arg6[%c0_6, %c0_7] : memref<16x128xf32, #tpu.memory_space<vmem>>, vector<16x128xf32>
    tpu.vector_store %arg6[%c0_6, %c0_7], %7 {strides = array<i32>} : memref<16x128xf32, #tpu.memory_space<vmem>>, vector<16x128xf32>,
    %c0_i32_8 = arith.constant 0 : i32
    %9 = arith.cmpi eq, %arg1, %c0_i32_8 : i32
    %10 = arith.extui %9 : i1 to i32
    %c0_i32_9 = arith.constant 0 : i32
    %11 = arith.cmpi ne, %10, %c0_i32_9 : i32
    scf.if %11 {
      %c0_10 = arith.constant 0 : index
      %c0_11 = arith.constant 0 : index
      %12 = vector.load %arg6[%c0_10, %c0_11] : memref<16x128xf32, #tpu.memory_space<vmem>>, vector<16x128xf32>
      %c0_12 = arith.constant 0 : index
      %c0_13 = arith.constant 0 : index
      %13 = vector.load %arg4[%c0_12, %c0_13] : memref<1x128xf32, #tpu.memory_space<vmem>>, vector<1x128xf32>
      %14 = vector.broadcast %13 : vector<1x128xf32> to vector<16x128xf32>
      %15 = arith.addf %12, %14 : vector<16x128xf32>
      %c0_14 = arith.constant 0 : index
      %c0_15 = arith.constant 0 : index
      %16 = vector.load %arg5[%c0_14, %c0_15] : memref<16x128xf32, #tpu.memory_space<vmem>>, vector<16x128xf32>
      tpu.vector_store %arg5[%c0_14, %c0_15], %15 {strides = array<i32>} : memref<16x128xf32, #tpu.memory_space<vmem>>, vector<16x128xf32>,
    } else {
    }
    return
  }
  func.func @transform_0(%arg0: i32, %arg1: i32) -> (i32, i32) {
    %c0_i32 = arith.constant 0 : i32
    return %arg0, %arg1 : i32, i32
  }
  func.func @transform_1(%arg0: i32, %arg1: i32) -> (i32, i32) {
    %c0_i32 = arith.constant 0 : i32
    %c0_i32_0 = arith.constant 0 : i32
    return %arg1, %c0_i32 : i32, i32
  }
  func.func @transform_2(%arg0: i32, %arg1: i32) -> (i32, i32) {
    %c0_i32 = arith.constant 0 : i32
    %c0_i32_0 = arith.constant 0 : i32
    %c0_i32_1 = arith.constant 0 : i32
    return %c0_i32, %c0_i32_0 : i32, i32
  }
  func.func @transform_3(%arg0: i32, %arg1: i32) -> (i32, i32) {
    %c0_i32 = arith.constant 0 : i32
    %c0_i32_0 = arith.constant 0 : i32
    return %arg0, %c0_i32 : i32, i32
  }
}

</mosaic_0001>

<bundles_post_ra>
// kernel: tpu_custom_call.1
= control target key start
LH: loop header
LB: loop body
LE: loop exit
PB: predicated region body
PF: predicated region fallthrough
CT: control target
= control target key end

     0   :  { %8 = vsyncpa [#allocation4], 0  ;;  %s400_s0 = inlined_call_operand.hbm [shape: bf16[16,128], index: 0, kind: input, shape index: {}]   ;;  %s401_s1 = inlined_call_operand.hbm [shape: bf16[128,128], index: 1, kind: input, shape index: {}]   ;;  %s402_s2 = inlined_call_operand.vmem [shape: f32[1,128], index: 2, kind: input, shape index: {}]   ;;  %s403_s3 = inlined_call_operand.hbm [shape: f32[16,128], index: 3, kind: output, shape index: {}]  }
   0x1   :  { %9 = vsyncpa [#allocation7], 0 }
   0x2   :  { %10 = vsyncpa [#allocation5], 0  ;;  %s332_s12 = smov [#allocation3]   ;;  %s260_s16 = scalar_lea.hbm %s400_s0, 128 }
   0x3   :  { %s16_s13 = sshll.u32 %s332_s12, 4  ;;  %p261_p0 = scmp.ne.s32.totalorder %s400_s0, %s260_s16  ;;  %s17_s13 = int_to_ptr.vmem [resolvable:$true] %s16_s13 }
   0x4   :  { %p264_p1 = scmp.lt.u32.totalorder %s260_s16, %s400_s0 }
   0x6   :  { %p266_p2 = pnand %p264_p1, %p261_p0 }
   0x8   :  { %269 = shalt.err (!%p266_p2)
}
   0x9   :  { %s270_s21 = scalar_lea.vmem %s17_s13, 128  ;;  %p275_p4 = scmp.lt.s32.totalorder %s17_s13, %s17_s13 }
   0xa   :  { %p271_p3 = scmp.ne.s32.totalorder %s17_s13, %s270_s21  ;;  %p276_p5 = scmp.lt.s32.totalorder %s270_s21, %s270_s21 }
   0xc   :  { %p277_p6 = por %p276_p5, %p275_p4 }
   0xe   :  { %p278_p7 = pnand %p277_p6, %p271_p3 }
  0x10   :  { %281 = shalt.err (!%p278_p7)
}
  0x11   :  { %s333_s22 = smov 64   ;;  %s334_s23 = smov 4  }
  0x12   :  { %22 = dma.hbm_to_vmem [thread:$0]  %s400_s0, 128, %s17_s13, [#allocation4], %s333_s22, %s333_s22, %s334_s23  }
  0x13   :  { %s335_s26 = smov [#allocation6]   ;;  %s282_s30 = scalar_lea.hbm %s401_s1, 1024 }
  0x14   :  { %s28_s27 = sshll.u32 %s335_s26, 4  ;;  %p283_p8 = scmp.ne.s32.totalorder %s401_s1, %s282_s30  ;;  %s29_s27 = int_to_ptr.vmem [resolvable:$true] %s28_s27 }
  0x15   :  { %p286_p9 = scmp.lt.u32.totalorder %s282_s30, %s401_s1 }
  0x17   :  { %p288_p10 = pnand %p286_p9, %p283_p8 }
  0x19   :  { %291 = shalt.err (!%p288_p10)
}
  0x1a   :  { %s292_s8 = scalar_lea.vmem %s29_s27, 1024  ;;  %p297_p12 = scmp.lt.s32.totalorder %s29_s27, %s29_s27 }
  0x1b   :  { %p293_p11 = scmp.ne.s32.totalorder %s29_s27, %s292_s8  ;;  %p298_p13 = scmp.lt.s32.totalorder %s292_s8, %s292_s8 }
  0x1d   :  { %p299_p0 = por %p298_p13, %p297_p12 }
  0x1f   :  { %p300_p1 = pnand %p299_p0, %p293_p11 }
  0x21   :  { %303 = shalt.err (!%p300_p1)
}
  0x22   :  { %34 = dma.hbm_to_vmem [thread:$0]  %s401_s1, 1024, %s29_s27, [#allocation7], %s333_s22, %s333_s22, %s334_s23  }
  0x23   :  { %326 = dma.done.wait [#allocation4], 128  }
  0x24   :  { %327 = vsyncadd [#allocation4], 4294967168 }
  0x25   :  { %328 = dma.done.wait [#allocation7], 1024  }
  0x26   :  { %329 = vsyncadd [#allocation7], 4294966272  ;;  %v336_v0 = vmov 0.0   ;;  %vm337_vm0 = vmmov 0   ;;  %v251_v1 = vld [vmem:[#allocation6] sm:$0xff]   ;;  %v252_v2 = vld [vmem:[#allocation6 + $0x8] sm:$0xff]  }
  0x27   :  { %222 = vmatprep.subr.bf16.mxu0 %v336_v0  ;;  %238 = vmatprep.mubr.msk.bf16.mxu0 %vm337_vm0, %v336_v0  ;;  %v253_v3 = vld [vmem:[#allocation6 + $0x10] sm:$0xff]   ;;  %v254_v4 = vld [vmem:[#allocation6 + $0x18] sm:$0xff]   ;;  %v255_v5 = vld [vmem:[#allocation6 + $0x20] sm:$0xff]   ;;  %s338_s11 = smov [#allocation8]  }
  0x28   :  { %223 = vmatpush3.bf16.msra.mxu0 %v251_v1  ;;  %v256_v6 = vld [vmem:[#allocation6 + $0x28] sm:$0xff]   ;;  %v257_v7 = vld [vmem:[#allocation6 + $0x30] sm:$0xff]   ;;  %v258_v8 = vld [vmem:[#allocation6 + $0x38] sm:$0xff]   ;;  %s190_s12 = sshll.u32 %s338_s11, 4  ;;  %s191_s12 = int_to_ptr.vmem [resolvable:$true] %s190_s12 }
  0x29   :  { %224 = vmatprep.subr.bf16.mxu0 %v336_v0  ;;  %v259_v9 = vld [vmem:[#allocation3] sm:$0xff]   ;;  %s304_s13 = scalar_lea.vmem %s191_s12, 256  ;;  %p309_p3 = scmp.lt.s32.totalorder %s191_s12, %s191_s12 }
  0x2a   :  { %v212_v10 = vld [vmem:[%s402_s2] ss:$0 sm:$0xff]  ;;  %p305_p2 = scmp.ne.s32.totalorder %s191_s12, %s304_s13  ;;  %p310_p4 = scmp.lt.s32.totalorder %s304_s13, %s304_s13 }
  0x2c   :  { %225 = vmatpush3.bf16.msra.mxu0 %v252_v2  ;;  %p311_p5 = por %p310_p4, %p309_p3 }
  0x2d   :  { %226 = vmatprep.subr.bf16.mxu0 %v336_v0 }
  0x2e   :  { %p312_p6 = pnand %p311_p5, %p305_p2 }
  0x30   :  { %227 = vmatpush3.bf16.msra.mxu0 %v253_v3 }
  0x31   :  { %228 = vmatprep.subr.bf16.mxu0 %v336_v0 }
  0x34   :  { %229 = vmatpush3.bf16.msra.mxu0 %v254_v4 }
  0x35   :  { %230 = vmatprep.subr.bf16.mxu0 %v336_v0 }
  0x38   :  { %231 = vmatpush3.bf16.msra.mxu0 %v255_v5 }
  0x39   :  { %232 = vmatprep.subr.bf16.mxu0 %v336_v0 }
  0x3c   :  { %233 = vmatpush3.bf16.msra.mxu0 %v256_v6 }
  0x3d   :  { %234 = vmatprep.subr.bf16.mxu0 %v336_v0 }
  0x40   :  { %235 = vmatpush3.bf16.msra.mxu0 %v257_v7 }
  0x41   :  { %236 = vmatprep.subr.bf16.mxu0 %v336_v0 }
  0x44   :  { %237 = vmatpush3.bf16.msra.mxu0 %v258_v8 }
  0x47   :  { %239 = vmatmul.mubr.bf16.vlgmr.msra.gmra.mrb[0].mxu0 %v259_v9 }
 0x11a   :  { %v158_v11 = vpop.f32.mrb[0].mxu0 }
 0x11b   :  { %v181_v12 = vadd.f32 %v212_v10, %v158_v11  ;;  %v240_v13 = vpop.f32.mrb[1].mxu0 }
 0x11c   :  { %v161_v14 = vpop.f32.mrb[2].mxu0 }
 0x11d   :  { %183 = vst [vmem:[#allocation8] sm:$0xff] %v181_v12  ;;  %v182_v15 = vadd.f32 %v212_v10, %v161_v14  ;;  %v241_v16 = vpop.f32.mrb[3].mxu0 }
 0x11f   :  { %184 = vst [vmem:[#allocation8 + $0x8] sm:$0xff] %v182_v15 }
 0x120   :  { %315 = shalt.err (!%p312_p6)
}
 0x121   :  { %s316_s15 = scalar_lea.hbm %s403_s3, 256 }
 0x122   :  { %p317_p7 = scmp.ne.s32.totalorder %s403_s3, %s316_s15  ;;  %p320_p8 = scmp.lt.u32.totalorder %s316_s15, %s403_s3 }
 0x124   :  { %p322_p9 = pnand %p320_p8, %p317_p7 }
 0x126   :  { %325 = shalt.err (!%p322_p9)
}
 0x127   :  { %s339_s20 = smov 128   ;;  %s340_s21 = smov 8  }
 0x128   :  { %196 = dma.vmem_to_hbm [thread:$0]  %s191_s12, 256, %s403_s3, [#allocation5], %s339_s20, %s339_s20, %s340_s21  }
 0x129   :  { %330 = dma.done.wait [#allocation5], 256  }
 0x12a   :  { %331 = vsyncadd [#allocation5], 4294967040 }
 0x12b   :  { %200 = vsyncpa [#allocation4], 1 }
 0x12c   :  { %201 = vsyncpa [#allocation7], 1 }
 0x12d   :  { %202 = vsyncpa [#allocation5], 1 }

</bundles_post_ra>
